<compile_context>
chip_gen: v5e
topology: v5e:2x2
jax: 0.10.0
libtpu: 0.0.40
codegen_flags: <defaults>
</compile_context>

<pallas_src>
import functools

import jax
import jax.numpy as jnp
from jax.experimental import pallas as pl
from jax.experimental.pallas import tpu as pltpu


# ---------------------------------------------------------------------------
# Fused GEMM + bias + activation Pallas kernel
# ---------------------------------------------------------------------------
def _mm_bias_act_kernel(*refs, act, nk):
    if nk == 1:
        a_ref, b_ref, bias_ref, o_ref = refs
        acc_ref = None
    else:
        a_ref, b_ref, bias_ref, o_ref, acc_ref = refs

    def epilogue(acc):
        r = acc + bias_ref[...]            # bias broadcasts over rows or cols
        if act == "relu":
            r = jnp.maximum(r, 0.0)
        elif act == "sigmoid":
            # exp -> EUP, approx reciprocal -> EUP: keeps the epilogue off the
            # VALU critical path.
            r = pl.reciprocal(1.0 + jnp.exp(-r), approx=True)
        return r.astype(o_ref.dtype)

    part = jnp.dot(a_ref[...], b_ref[...], preferred_element_type=jnp.float32)

    if nk == 1:
        # Single K block: fully fused, one store, no accumulator traffic.
        o_ref[...] = epilogue(part)
    else:
        k = pl.program_id(1)

        @pl.when(k == 0)
        def _():
            acc_ref[...] = jnp.zeros_like(acc_ref)

        acc_ref[...] += part

        @pl.when(k == nk - 1)
        def _():
            o_ref[...] = epilogue(acc_ref[...])


def _pick_tile_n(n):
    """Largest 128-multiple tile that splits N into >=2 blocks, else full N."""
    for t in (256, 128):
        if n % t == 0 and n // t >= 2:
            return t
    return n


def _pick_tile_k(k):
    """Single K block for small K; 128-multiple tiles for large K."""
    if k <= 2048:
        return k
    for t in (512, 256, 128):
        if k % t == 0:
            return t
    return k


def fused_matmul(a, b, bias, act="none", bias_along="n", out_dtype=jnp.float32):
    """out = act(a @ b + bias).

    a: (M, K), b: (K, N) -> cast to bf16 (f32 accumulation on the MXU).
    bias: (1, N) if bias_along == "n", (M, 1) if bias_along == "m".
    Returns (M, N) in `out_dtype`. No padding / slicing: blocks are either
    full-dim or 128-multiples along the lane axis.
    """
    M, K = a.shape
    K2, N = b.shape
    assert K == K2
    a = a.astype(jnp.bfloat16)
    b = b.astype(jnp.bfloat16)
    bias = bias.astype(jnp.float32)

    tn = _pick_tile_n(N)
    tk = _pick_tile_k(K)
    gn, gk = N // tn, K // tk

    if bias_along == "n":
        assert bias.shape == (1, N)
        bias_spec = pl.BlockSpec((1, tn), lambda j, k: (0, j))
    else:
        assert bias.shape == (M, 1)
        bias_spec = pl.BlockSpec((M, 1), lambda j, k: (0, 0))

    out_bytes = jnp.dtype(out_dtype).itemsize
    cost = pl.CostEstimate(
        flops=2 * M * K * N,
        transcendentals=(M * N) if act == "sigmoid" else 0,
        bytes_accessed=2 * M * K + 2 * K * N + 4 * bias.size + out_bytes * M * N,
    )

    # f32 scratch accumulator only when K is actually tiled (keeps bf16
    # outputs exact and avoids HBM round-trips of partial sums).
    scratch = [pltpu.VMEM((M, tn), jnp.float32)] if gk > 1 else []

    return pl.pallas_call(
        functools.partial(_mm_bias_act_kernel, act=act, nk=gk),
        out_shape=jax.ShapeDtypeStruct((M, N), out_dtype),
        grid_spec=pltpu.PrefetchScalarGridSpec(
            num_scalar_prefetch=0,
            grid=(gn, gk),
            in_specs=[
                pl.BlockSpec((M, tk), lambda j, k: (0, k)),
                pl.BlockSpec((tk, tn), lambda j, k: (k, j)),
                bias_spec,
            ],
            out_specs=pl.BlockSpec((M, tn), lambda j, k: (0, j)),
            scratch_shapes=scratch),
        compiler_params=pltpu.CompilerParams(
            dimension_semantics=("parallel", "arbitrary")),
        cost_estimate=cost,
    )(a, b, bias)


# ---------------------------------------------------------------------------
# Fused encoder-FC + decoder-FC kernel: z = x @ W1 + b1 ; h = relu(z @ W2 + b2)
# One pallas_call produces both the feature embedding (f32, module output) and
# the decoder hidden activation (bf16, internal).
# ---------------------------------------------------------------------------
def _enc_dec_fc_kernel(a_ref, w1_ref, b1_ref, w2_ref, b2_ref, z_ref, h_ref):
    z = jnp.dot(a_ref[...], w1_ref[...],
                preferred_element_type=jnp.float32) + b1_ref[...]
    z_ref[...] = z
    h = jnp.dot(z.astype(jnp.bfloat16), w2_ref[...],
                preferred_element_type=jnp.float32) + b2_ref[...]
    h_ref[...] = jnp.maximum(h, 0.0).astype(h_ref.dtype)


def _fc_fuse_fits(B, flat, F, out_flat, budget_bytes=12 * 1024 * 1024):
    need = (2 * B * flat + 2 * flat * F + 2 * F * out_flat
            + 4 * F + 4 * out_flat + 4 * B * F + 2 * B * out_flat)
    return need < budget_bytes


def fused_enc_dec_fc(x_flat, enc_w, enc_b, dec_w, dec_b):
    """x_flat: (B, flat); enc_w: (F, flat); dec_w: (out_flat, F).
    Returns (z f32 (B,F), h bf16 (B,out_flat))."""
    B, flat = x_flat.shape
    F = enc_w.shape[0]
    out_flat = dec_w.shape[0]
    a = x_flat.astype(jnp.bfloat16)
    w1 = enc_w.T.astype(jnp.bfloat16)                 # (flat, F)
    w2 = dec_w.T.astype(jnp.bfloat16)                 # (F, out_flat)
    b1 = enc_b[None, :].astype(jnp.float32)
    b2 = dec_b[None, :].astype(jnp.float32)
    cost = pl.CostEstimate(
        flops=2 * B * flat * F + 2 * B * F * out_flat,
        transcendentals=0,
        bytes_accessed=(2 * B * flat + 2 * flat * F + 2 * F * out_flat
                        + 4 * F + 4 * out_flat + 4 * B * F + 2 * B * out_flat),
    )
    return pl.pallas_call(
        _enc_dec_fc_kernel,
        out_shape=(jax.ShapeDtypeStruct((B, F), jnp.float32),
                   jax.ShapeDtypeStruct((B, out_flat), jnp.bfloat16)),
        cost_estimate=cost,
    )(a, w1, b1, w2, b2)


# ---------------------------------------------------------------------------
# Conv / deconv / linear layers expressed through the fused Pallas GEMM.
# Activations are kept in (C, B, H, W) layout so the big B*H*W dim lands on
# the GEMM lane axis with zero extra transposes between layers.
# ---------------------------------------------------------------------------
def conv2d_cbhw(x, w, b, stride, pad, act, out_dtype=jnp.float32):
    """Conv2d on (Cin, B, H, W). w: (Cout, Cin, kh, kw), b: (Cout,).
    Returns (Cout, B, Ho, Wo)."""
    Cin, B, H, W = x.shape
    Cout, _, kh, kw = w.shape
    Ho = (H + 2 * pad - kh) // stride + 1
    Wo = (W + 2 * pad - kw) // stride + 1
    xp = jnp.pad(x, ((0, 0), (0, 0), (pad, pad), (pad, pad)))
    patches = [xp[:, :, i:i + stride * Ho:stride, j:j + stride * Wo:stride]
               for i in range(kh) for j in range(kw)]
    # (Cin, kh*kw, B, Ho, Wo) -> (Cin*kh*kw, B*Ho*Wo): rows match W's reshape.
    cols_t = jnp.stack(patches, axis=1).reshape(Cin * kh * kw, B * Ho * Wo)
    w_mat = w.reshape(Cout, Cin * kh * kw)
    y = fused_matmul(w_mat, cols_t, b[:, None], act=act, bias_along="m",
                     out_dtype=out_dtype)
    return y.reshape(Cout, B, Ho, Wo)


def conv_transpose2d_k2s2_cbhw(x, w, b, act, out_dtype=jnp.float32):
    """ConvTranspose2d(kernel=2, stride=2) on (Cin, B, H, W).
    w: (Cin, Cout, 2, 2), b: (Cout,). Returns (Cout, B, 2H, 2W)."""
    Cin, B, H, W = x.shape
    _, Cout, kh, kw = w.shape
    a_mat = w.transpose(1, 2, 3, 0).reshape(Cout * kh * kw, Cin)  # rows=(co,i,j)
    b_mat = x.reshape(Cin, B * H * W)                             # zero-cost
    bias_rows = jnp.repeat(b, kh * kw)[:, None]                   # (Cout*4, 1)
    # No overlapping outputs for k=2/s=2, so per-element bias+activation
    # before scatter-reassembly is exact.
    y = fused_matmul(a_mat, b_mat, bias_rows, act=act, bias_along="m",
                     out_dtype=out_dtype)
    y = y.reshape(Cout, kh, kw, B, H, W)
    y = y.transpose(0, 3, 4, 1, 5, 2).reshape(Cout, B, kh * H, kw * W)
    return y


def linear(x, w, b, act, out_dtype=jnp.float32):
    """x: (B, in), w: (out, in), b: (out,) -> (B, out)."""
    return fused_matmul(x, w.T, b[None, :], act=act, bias_along="n",
                        out_dtype=out_dtype)


# ---------------------------------------------------------------------------
# TripletAutoencoder (JAX/Pallas)
# ---------------------------------------------------------------------------
def init_params(key, features, img_channels, img_dim):
    d4 = img_dim // 4
    flat = 32 * d4 * d4
    ks = jax.random.split(key, 10)

    def nrm(k, shape, scale=0.05):
        return (scale * jax.random.normal(k, shape)).astype(jnp.float32)

    return {
        # encoder
        "conv1_w": nrm(ks[0], (16, img_channels, 3, 3)),
        "conv1_b": nrm(ks[1], (16,)),
        "conv2_w": nrm(ks[2], (32, 16, 3, 3)),
        "conv2_b": nrm(ks[3], (32,)),
        "enc_fc_w": nrm(ks[4], (features, flat)),
        "enc_fc_b": nrm(ks[5], (features,)),
        # decoder
        "dec_fc_w": nrm(ks[6], (flat, features)),
        "dec_fc_b": nrm(ks[7], (flat,)),
        "deconv1_w": nrm(ks[8], (32, 16, 2, 2)),
        "deconv1_b": jnp.zeros((16,), jnp.float32),
        "deconv2_w": nrm(ks[9], (16, img_channels, 2, 2)),
        "deconv2_b": jnp.zeros((img_channels,), jnp.float32),
    }


def triplet_autoencoder_forward(params, anchor, positive, negative, img_dim):
    B = anchor.shape[0]
    d4 = img_dim // 4
    flat = 32 * d4 * d4

    # Shared-weight encoder/decoder: batching the triplet is mathematically
    # identical to three separate passes (all layers are batch-independent).
    x = jnp.concatenate([anchor, positive, negative], axis=0)   # (3B, C, D, D)
    x = x.transpose(1, 0, 2, 3).astype(jnp.bfloat16)            # (C, 3B, D, D)

    # ----- encoder convs (bf16 intermediates) -----
    h = conv2d_cbhw(x, params["conv1_w"], params["conv1_b"],
                    stride=2, pad=1, act="relu",
                    out_dtype=jnp.bfloat16)                     # (16, 3B, D/2, D/2)
    h = conv2d_cbhw(h, params["conv2_w"], params["conv2_b"],
                    stride=2, pad=1, act="relu",
                    out_dtype=jnp.bfloat16)                     # (32, 3B, D/4, D/4)
    C32, B3, Hq, Wq = h.shape
    h_flat = h.transpose(1, 0, 2, 3).reshape(B3, C32 * Hq * Wq)  # PyTorch flatten

    # ----- encoder FC (+ Dropout at eval = identity) and decoder FC -----
    features = params["enc_fc_w"].shape[0]
    if _fc_fuse_fits(B3, flat, features, flat):
        z, hd = fused_enc_dec_fc(h_flat,
                                 params["enc_fc_w"], params["enc_fc_b"],
                                 params["dec_fc_w"], params["dec_fc_b"])
    else:
        z = linear(h_flat, params["enc_fc_w"], params["enc_fc_b"],
                   act="none", out_dtype=jnp.float32)
        hd = linear(z, params["dec_fc_w"], params["dec_fc_b"],
                    act="relu", out_dtype=jnp.bfloat16)

    # ----- decoder deconvs -----
    hd = hd.reshape(B3, 32, d4, d4).transpose(1, 0, 2, 3)       # (32, 3B, D/4, D/4)
    hd = conv_transpose2d_k2s2_cbhw(hd, params["deconv1_w"],
                                    params["deconv1_b"], act="relu",
                                    out_dtype=jnp.bfloat16)     # (16, 3B, D/2, D/2)
    rec = conv_transpose2d_k2s2_cbhw(hd, params["deconv2_w"],
                                     params["deconv2_b"], act="sigmoid",
                                     out_dtype=jnp.float32)     # (C, 3B, D, D)
    rec = rec.transpose(1, 0, 2, 3)                             # (3B, C, D, D)

    z_a, z_p, z_n = z[:B], z[B:2 * B], z[2 * B:]
    rec_a, rec_p, rec_n = rec[:B], rec[B:2 * B], rec[2 * B:]
    return z_a, z_p, z_n, rec_a, rec_p, rec_n


# ---------------------------------------------------------------------------
if __name__ == "__main__":
    # Small shapes consistent with the module: batch=2, channels=4, dim=16.
    features = 32
    batch, img_channels, img_dim = 2, 4, 16

    key = jax.random.PRNGKey(0)
    kp, ka, kpos, kneg = jax.random.split(key, 4)

    params = init_params(kp, features, img_channels, img_dim)
    shape = (batch, img_channels, img_dim, img_dim)
    anchor = jax.random.uniform(ka, shape, dtype=jnp.float32)
    positive = jax.random.uniform(kpos, shape, dtype=jnp.float32)
    negative = jax.random.uniform(kneg, shape, dtype=jnp.float32)

    fwd = jax.jit(triplet_autoencoder_forward, static_argnames=("img_dim",))
    outs = fwd(params, anchor, positive, negative, img_dim=img_dim)
    outs = jax.block_until_ready(outs)

    z_a, z_p, z_n, rec_a, rec_p, rec_n = outs
    assert z_a.shape == (batch, features)
    assert z_p.shape == (batch, features)
    assert z_n.shape == (batch, features)
    assert rec_a.shape == (batch, img_channels, img_dim, img_dim)
    assert rec_p.shape == (batch, img_channels, img_dim, img_dim)
    assert rec_n.shape == (batch, img_channels, img_dim, img_dim)
    assert all(jnp.isfinite(o).all() for o in outs)

    print("KERNEL_OK")
</pallas_src>

<mosaic_0001>
module attributes {stable_mosaic.version = 11 : i64} {
  func.func @_mm_bias_act_kernel(%arg0: i32, %arg1: i32, %arg2: memref<16x36xbf16, #tpu.memory_space<vmem>>, %arg3: memref<36x128xbf16, #tpu.memory_space<vmem>>, %arg4: memref<16x1xf32, #tpu.memory_space<vmem>>, %arg5: memref<16x128xbf16, #tpu.memory_space<vmem>>) attributes {dimension_semantics = [#tpu.dimension_semantics<parallel>, #tpu.dimension_semantics<arbitrary>], iteration_bounds = array<i64: 3, 1>, scalar_prefetch = 0 : i64, scratch_operands = 0 : i64, tpu.core_type = #tpu.core_type<tc>, window_params = [{transform_indices = @transform_0, window_bounds = array<i64: 16, 36>}, {transform_indices = @transform_1, window_bounds = array<i64: 36, 128>}, {pipeline_mode = #tpu.pipeline_mode<synchronous>, transform_indices = @transform_2, window_bounds = array<i64: 16, 1>}, {transform_indices = @transform_3, window_bounds = array<i64: 16, 128>}]} {
    %c0 = arith.constant 0 : index
    %c0_0 = arith.constant 0 : index
    %0 = vector.load %arg2[%c0, %c0_0] : memref<16x36xbf16, #tpu.memory_space<vmem>>, vector<16x36xbf16>
    %c0_1 = arith.constant 0 : index
    %c0_2 = arith.constant 0 : index
    %1 = vector.load %arg3[%c0_1, %c0_2] : memref<36x128xbf16, #tpu.memory_space<vmem>>, vector<36x128xbf16>
    %cst = arith.constant dense<0.000000e+00> : vector<16x128xf32>
    %2 = tpu.matmul %0, %1, %cst {dimension_numbers = #tpu.dot_dimension_numbers<[1], [0], [0], [1], [0, 0, 1, 1], [], []>} : vector<16x36xbf16>, vector<36x128xbf16>, vector<16x128xf32> -> vector<16x128xf32>
    %c0_3 = arith.constant 0 : index
    %c0_4 = arith.constant 0 : index
    %3 = vector.load %arg4[%c0_3, %c0_4] : memref<16x1xf32, #tpu.memory_space<vmem>>, vector<16x1xf32>
    %4 = vector.broadcast %3 : vector<16x1xf32> to vector<16x128xf32>
    %5 = arith.addf %2, %4 : vector<16x128xf32>
    %cst_5 = arith.constant 0.000000e+00 : f32
    %6 = vector.broadcast %cst_5 : f32 to vector<16x128xf32>
    %7 = arith.maximumf %5, %6 : vector<16x128xf32>
    %8 = arith.truncf %7 : vector<16x128xf32> to vector<16x128xbf16>
    %c0_6 = arith.constant 0 : index
    %c0_7 = arith.constant 0 : index
    %9 = vector.load %arg5[%c0_6, %c0_7] : memref<16x128xbf16, #tpu.memory_space<vmem>>, vector<16x128xbf16>
    tpu.vector_store %arg5[%c0_6, %c0_7], %8 {strides = array<i32>} : memref<16x128xbf16, #tpu.memory_space<vmem>>, vector<16x128xbf16>,
    return
  }
  func.func @transform_0(%arg0: i32, %arg1: i32) -> (i32, i32) {
    %c0_i32 = arith.constant 0 : i32
    %c0_i32_0 = arith.constant 0 : i32
    return %c0_i32, %arg1 : i32, i32
  }
  func.func @transform_1(%arg0: i32, %arg1: i32) -> (i32, i32) {
    %c0_i32 = arith.constant 0 : i32
    return %arg1, %arg0 : i32, i32
  }
  func.func @transform_2(%arg0: i32, %arg1: i32) -> (i32, i32) {
    %c0_i32 = arith.constant 0 : i32
    %c0_i32_0 = arith.constant 0 : i32
    %c0_i32_1 = arith.constant 0 : i32
    return %c0_i32, %c0_i32_0 : i32, i32
  }
  func.func @transform_3(%arg0: i32, %arg1: i32) -> (i32, i32) {
    %c0_i32 = arith.constant 0 : i32
    %c0_i32_0 = arith.constant 0 : i32
    return %c0_i32, %arg0 : i32, i32
  }
}

module attributes {stable_mosaic.version = 11 : i64} {
  func.func @_mm_bias_act_kernel(%arg0: i32, %arg1: i32, %arg2: memref<32x144xbf16, #tpu.memory_space<vmem>>, %arg3: memref<144x96xbf16, #tpu.memory_space<vmem>>, %arg4: memref<32x1xf32, #tpu.memory_space<vmem>>, %arg5: memref<32x96xbf16, #tpu.memory_space<vmem>>) attributes {dimension_semantics = [#tpu.dimension_semantics<parallel>, #tpu.dimension_semantics<arbitrary>], iteration_bounds = array<i64: 1, 1>, scalar_prefetch = 0 : i64, scratch_operands = 0 : i64, tpu.core_type = #tpu.core_type<tc>, window_params = [{transform_indices = @transform_0, window_bounds = array<i64: 32, 144>}, {transform_indices = @transform_1, window_bounds = array<i64: 144, 96>}, {pipeline_mode = #tpu.pipeline_mode<synchronous>, transform_indices = @transform_2, window_bounds = array<i64: 32, 1>}, {transform_indices = @transform_3, window_bounds = array<i64: 32, 96>}]} {
    %c0 = arith.constant 0 : index
    %c0_0 = arith.constant 0 : index
    %0 = vector.load %arg2[%c0, %c0_0] : memref<32x144xbf16, #tpu.memory_space<vmem>>, vector<32x144xbf16>
    %c0_1 = arith.constant 0 : index
    %c0_2 = arith.constant 0 : index
    %1 = vector.load %arg3[%c0_1, %c0_2] : memref<144x96xbf16, #tpu.memory_space<vmem>>, vector<144x96xbf16>
    %cst = arith.constant dense<0.000000e+00> : vector<32x96xf32>
    %2 = tpu.matmul %0, %1, %cst {dimension_numbers = #tpu.dot_dimension_numbers<[1], [0], [0], [1], [0, 0, 1, 1], [], []>} : vector<32x144xbf16>, vector<144x96xbf16>, vector<32x96xf32> -> vector<32x96xf32>
    %c0_3 = arith.constant 0 : index
    %c0_4 = arith.constant 0 : index
    %3 = vector.load %arg4[%c0_3, %c0_4] : memref<32x1xf32, #tpu.memory_space<vmem>>, vector<32x1xf32>
    %4 = vector.broadcast %3 : vector<32x1xf32> to vector<32x96xf32>
    %5 = arith.addf %2, %4 : vector<32x96xf32>
    %cst_5 = arith.constant 0.000000e+00 : f32
    %6 = vector.broadcast %cst_5 : f32 to vector<32x96xf32>
    %7 = arith.maximumf %5, %6 : vector<32x96xf32>
    %8 = arith.truncf %7 : vector<32x96xf32> to vector<32x96xbf16>
    %c0_6 = arith.constant 0 : index
    %c0_7 = arith.constant 0 : index
    %9 = vector.load %arg5[%c0_6, %c0_7] : memref<32x96xbf16, #tpu.memory_space<vmem>>, vector<32x96xbf16>
    tpu.vector_store %arg5[%c0_6, %c0_7], %8 {strides = array<i32>} : memref<32x96xbf16, #tpu.memory_space<vmem>>, vector<32x96xbf16>,
    return
  }
  func.func @transform_0(%arg0: i32, %arg1: i32) -> (i32, i32) {
    %c0_i32 = arith.constant 0 : i32
    %c0_i32_0 = arith.constant 0 : i32
    return %c0_i32, %arg1 : i32, i32
  }
  func.func @transform_1(%arg0: i32, %arg1: i32) -> (i32, i32) {
    %c0_i32 = arith.constant 0 : i32
    return %arg1, %arg0 : i32, i32
  }
  func.func @transform_2(%arg0: i32, %arg1: i32) -> (i32, i32) {
    %c0_i32 = arith.constant 0 : i32
    %c0_i32_0 = arith.constant 0 : i32
    %c0_i32_1 = arith.constant 0 : i32
    return %c0_i32, %c0_i32_0 : i32, i32
  }
  func.func @transform_3(%arg0: i32, %arg1: i32) -> (i32, i32) {
    %c0_i32 = arith.constant 0 : i32
    %c0_i32_0 = arith.constant 0 : i32
    return %c0_i32, %arg0 : i32, i32
  }
}

module attributes {stable_mosaic.version = 11 : i64} {
  func.func @_enc_dec_fc_kernel(%arg0: memref<6x512xbf16, #tpu.memory_space<vmem>>, %arg1: memref<512x32xbf16, #tpu.memory_space<vmem>>, %arg2: memref<1x32xf32, #tpu.memory_space<vmem>>, %arg3: memref<32x512xbf16, #tpu.memory_space<vmem>>, %arg4: memref<1x512xf32, #tpu.memory_space<vmem>>, %arg5: memref<6x32xf32, #tpu.memory_space<vmem>>, %arg6: memref<6x512xbf16, #tpu.memory_space<vmem>>) attributes {dimension_semantics = [], scalar_prefetch = 0 : i64, scratch_operands = 0 : i64, tpu.core_type = #tpu.core_type<tc>} {
    %c0 = arith.constant 0 : index
    %c0_0 = arith.constant 0 : index
    %0 = vector.load %arg0[%c0, %c0_0] : memref<6x512xbf16, #tpu.memory_space<vmem>>, vector<6x512xbf16>
    %c0_1 = arith.constant 0 : index
    %c0_2 = arith.constant 0 : index
    %1 = vector.load %arg1[%c0_1, %c0_2] : memref<512x32xbf16, #tpu.memory_space<vmem>>, vector<512x32xbf16>
    %cst = arith.constant dense<0.000000e+00> : vector<6x32xf32>
    %2 = tpu.matmul %0, %1, %cst {dimension_numbers = #tpu.dot_dimension_numbers<[1], [0], [0], [1], [0, 0, 1, 1], [], []>} : vector<6x512xbf16>, vector<512x32xbf16>, vector<6x32xf32> -> vector<6x32xf32>
    %c0_3 = arith.constant 0 : index
    %c0_4 = arith.constant 0 : index
    %3 = vector.load %arg2[%c0_3, %c0_4] : memref<1x32xf32, #tpu.memory_space<vmem>>, vector<1x32xf32>
    %4 = vector.broadcast %3 : vector<1x32xf32> to vector<6x32xf32>
    %5 = arith.addf %2, %4 : vector<6x32xf32>
    %c0_5 = arith.constant 0 : index
    %c0_6 = arith.constant 0 : index
    %6 = vector.load %arg5[%c0_5, %c0_6] : memref<6x32xf32, #tpu.memory_space<vmem>>, vector<6x32xf32>
    tpu.vector_store %arg5[%c0_5, %c0_6], %5 {strides = array<i32>} : memref<6x32xf32, #tpu.memory_space<vmem>>, vector<6x32xf32>,
    %7 = arith.truncf %5 : vector<6x32xf32> to vector<6x32xbf16>
    %c0_7 = arith.constant 0 : index
    %c0_8 = arith.constant 0 : index
    %8 = vector.load %arg3[%c0_7, %c0_8] : memref<32x512xbf16, #tpu.memory_space<vmem>>, vector<32x512xbf16>
    %cst_9 = arith.constant dense<0.000000e+00> : vector<6x512xf32>
    %9 = tpu.matmul %7, %8, %cst_9 {dimension_numbers = #tpu.dot_dimension_numbers<[1], [0], [0], [1], [0, 0, 1, 1], [], []>} : vector<6x32xbf16>, vector<32x512xbf16>, vector<6x512xf32> -> vector<6x512xf32>
    %c0_10 = arith.constant 0 : index
    %c0_11 = arith.constant 0 : index
    %10 = vector.load %arg4[%c0_10, %c0_11] : memref<1x512xf32, #tpu.memory_space<vmem>>, vector<1x512xf32>
    %11 = vector.broadcast %10 : vector<1x512xf32> to vector<6x512xf32>
    %12 = arith.addf %9, %11 : vector<6x512xf32>
    %cst_12 = arith.constant 0.000000e+00 : f32
    %13 = vector.broadcast %cst_12 : f32 to vector<6x512xf32>
    %14 = arith.maximumf %12, %13 : vector<6x512xf32>
    %15 = arith.truncf %14 : vector<6x512xf32> to vector<6x512xbf16>
    %c0_13 = arith.constant 0 : index
    %c0_14 = arith.constant 0 : index
    %16 = vector.load %arg6[%c0_13, %c0_14] : memref<6x512xbf16, #tpu.memory_space<vmem>>, vector<6x512xbf16>
    tpu.vector_store %arg6[%c0_13, %c0_14], %15 {strides = array<i32>} : memref<6x512xbf16, #tpu.memory_space<vmem>>, vector<6x512xbf16>,
    return
  }
}

module attributes {stable_mosaic.version = 11 : i64} {
  func.func @_mm_bias_act_kernel(%arg0: i32, %arg1: i32, %arg2: memref<64x32xbf16, #tpu.memory_space<vmem>>, %arg3: memref<32x96xbf16, #tpu.memory_space<vmem>>, %arg4: memref<64x1xf32, #tpu.memory_space<vmem>>, %arg5: memref<64x96xbf16, #tpu.memory_space<vmem>>) attributes {dimension_semantics = [#tpu.dimension_semantics<parallel>, #tpu.dimension_semantics<arbitrary>], iteration_bounds = array<i64: 1, 1>, scalar_prefetch = 0 : i64, scratch_operands = 0 : i64, tpu.core_type = #tpu.core_type<tc>, window_params = [{transform_indices = @transform_0, window_bounds = array<i64: 64, 32>}, {transform_indices = @transform_1, window_bounds = array<i64: 32, 96>}, {pipeline_mode = #tpu.pipeline_mode<synchronous>, transform_indices = @transform_2, window_bounds = array<i64: 64, 1>}, {transform_indices = @transform_3, window_bounds = array<i64: 64, 96>}]} {
    %c0 = arith.constant 0 : index
    %c0_0 = arith.constant 0 : index
    %0 = vector.load %arg2[%c0, %c0_0] : memref<64x32xbf16, #tpu.memory_space<vmem>>, vector<64x32xbf16>
    %c0_1 = arith.constant 0 : index
    %c0_2 = arith.constant 0 : index
    %1 = vector.load %arg3[%c0_1, %c0_2] : memref<32x96xbf16, #tpu.memory_space<vmem>>, vector<32x96xbf16>
    %cst = arith.constant dense<0.000000e+00> : vector<64x96xf32>
    %2 = tpu.matmul %0, %1, %cst {dimension_numbers = #tpu.dot_dimension_numbers<[1], [0], [0], [1], [0, 0, 1, 1], [], []>} : vector<64x32xbf16>, vector<32x96xbf16>, vector<64x96xf32> -> vector<64x96xf32>
    %c0_3 = arith.constant 0 : index
    %c0_4 = arith.constant 0 : index
    %3 = vector.load %arg4[%c0_3, %c0_4] : memref<64x1xf32, #tpu.memory_space<vmem>>, vector<64x1xf32>
    %4 = vector.broadcast %3 : vector<64x1xf32> to vector<64x96xf32>
    %5 = arith.addf %2, %4 : vector<64x96xf32>
    %cst_5 = arith.constant 0.000000e+00 : f32
    %6 = vector.broadcast %cst_5 : f32 to vector<64x96xf32>
    %7 = arith.maximumf %5, %6 : vector<64x96xf32>
    %8 = arith.truncf %7 : vector<64x96xf32> to vector<64x96xbf16>
    %c0_6 = arith.constant 0 : index
    %c0_7 = arith.constant 0 : index
    %9 = vector.load %arg5[%c0_6, %c0_7] : memref<64x96xbf16, #tpu.memory_space<vmem>>, vector<64x96xbf16>
    tpu.vector_store %arg5[%c0_6, %c0_7], %8 {strides = array<i32>} : memref<64x96xbf16, #tpu.memory_space<vmem>>, vector<64x96xbf16>,
    return
  }
  func.func @transform_0(%arg0: i32, %arg1: i32) -> (i32, i32) {
    %c0_i32 = arith.constant 0 : i32
    %c0_i32_0 = arith.constant 0 : i32
    return %c0_i32, %arg1 : i32, i32
  }
  func.func @transform_1(%arg0: i32, %arg1: i32) -> (i32, i32) {
    %c0_i32 = arith.constant 0 : i32
    return %arg1, %arg0 : i32, i32
  }
  func.func @transform_2(%arg0: i32, %arg1: i32) -> (i32, i32) {
    %c0_i32 = arith.constant 0 : i32
    %c0_i32_0 = arith.constant 0 : i32
    %c0_i32_1 = arith.constant 0 : i32
    return %c0_i32, %c0_i32_0 : i32, i32
  }
  func.func @transform_3(%arg0: i32, %arg1: i32) -> (i32, i32) {
    %c0_i32 = arith.constant 0 : i32
    %c0_i32_0 = arith.constant 0 : i32
    return %c0_i32, %arg0 : i32, i32
  }
}

module attributes {stable_mosaic.version = 11 : i64} {
  func.func @_mm_bias_act_kernel(%arg0: i32, %arg1: i32, %arg2: memref<16x16xbf16, #tpu.memory_space<vmem>>, %arg3: memref<16x128xbf16, #tpu.memory_space<vmem>>, %arg4: memref<16x1xf32, #tpu.memory_space<vmem>>, %arg5: memref<16x128xf32, #tpu.memory_space<vmem>>) attributes {dimension_semantics = [#tpu.dimension_semantics<parallel>, #tpu.dimension_semantics<arbitrary>], iteration_bounds = array<i64: 3, 1>, scalar_prefetch = 0 : i64, scratch_operands = 0 : i64, tpu.core_type = #tpu.core_type<tc>, window_params = [{transform_indices = @transform_0, window_bounds = array<i64: 16, 16>}, {transform_indices = @transform_1, window_bounds = array<i64: 16, 128>}, {pipeline_mode = #tpu.pipeline_mode<synchronous>, transform_indices = @transform_2, window_bounds = array<i64: 16, 1>}, {transform_indices = @transform_3, window_bounds = array<i64: 16, 128>}]} {
    %c0 = arith.constant 0 : index
    %c0_0 = arith.constant 0 : index
    %0 = vector.load %arg2[%c0, %c0_0] : memref<16x16xbf16, #tpu.memory_space<vmem>>, vector<16x16xbf16>
    %c0_1 = arith.constant 0 : index
    %c0_2 = arith.constant 0 : index
    %1 = vector.load %arg3[%c0_1, %c0_2] : memref<16x128xbf16, #tpu.memory_space<vmem>>, vector<16x128xbf16>
    %cst = arith.constant dense<0.000000e+00> : vector<16x128xf32>
    %2 = tpu.matmul %0, %1, %cst {dimension_numbers = #tpu.dot_dimension_numbers<[1], [0], [0], [1], [0, 0, 1, 1], [], []>} : vector<16x16xbf16>, vector<16x128xbf16>, vector<16x128xf32> -> vector<16x128xf32>
    %c0_3 = arith.constant 0 : index
    %c0_4 = arith.constant 0 : index
    %3 = vector.load %arg4[%c0_3, %c0_4] : memref<16x1xf32, #tpu.memory_space<vmem>>, vector<16x1xf32>
    %4 = vector.broadcast %3 : vector<16x1xf32> to vector<16x128xf32>
    %5 = arith.addf %2, %4 : vector<16x128xf32>
    %cst_5 = arith.constant 0.000000e+00 : f32
    %6 = vector.broadcast %cst_5 : f32 to vector<16x128xf32>
    %7 = arith.subf %6, %5 : vector<16x128xf32>
    %8 = math.exp %7 : vector<16x128xf32>
    %cst_6 = arith.constant 1.000000e+00 : f32
    %9 = vector.broadcast %cst_6 : f32 to vector<16x128xf32>
    %10 = arith.addf %9, %8 : vector<16x128xf32>
    %11 = tpu.reciprocal %10 {approx = true} : vector<16x128xf32> -> vector<16x128xf32>
    %c0_7 = arith.constant 0 : index
    %c0_8 = arith.constant 0 : index
    %12 = vector.load %arg5[%c0_7, %c0_8] : memref<16x128xf32, #tpu.memory_space<vmem>>, vector<16x128xf32>
    tpu.vector_store %arg5[%c0_7, %c0_8], %11 {strides = array<i32>} : memref<16x128xf32, #tpu.memory_space<vmem>>, vector<16x128xf32>,
    return
  }
  func.func @transform_0(%arg0: i32, %arg1: i32) -> (i32, i32) {
    %c0_i32 = arith.constant 0 : i32
    %c0_i32_0 = arith.constant 0 : i32
    return %c0_i32, %arg1 : i32, i32
  }
  func.func @transform_1(%arg0: i32, %arg1: i32) -> (i32, i32) {
    %c0_i32 = arith.constant 0 : i32
    return %arg1, %arg0 : i32, i32
  }
  func.func @transform_2(%arg0: i32, %arg1: i32) -> (i32, i32) {
    %c0_i32 = arith.constant 0 : i32
    %c0_i32_0 = arith.constant 0 : i32
    %c0_i32_1 = arith.constant 0 : i32
    return %c0_i32, %c0_i32_0 : i32, i32
  }
  func.func @transform_3(%arg0: i32, %arg1: i32) -> (i32, i32) {
    %c0_i32 = arith.constant 0 : i32
    %c0_i32_0 = arith.constant 0 : i32
    return %c0_i32, %arg0 : i32, i32
  }
}

</mosaic_0001>

<bundles_post_ra>
// kernel: triplet_autoencoder_forward.5
= control target key start
LH: loop header
LB: loop body
LE: loop exit
PB: predicated region body
PF: predicated region fallthrough
CT: control target
= control target key end

     0   :  { %s601_s12 = smov 0   ;;  %s603_s13 = smov 0   ;;  %s682_s0 = inlined_call_operand.vmem [shape: bf16[16,36], index: 0, kind: input, shape index: {}]   ;;  %s683_s1 = inlined_call_operand.vmem [shape: bf16[36,384], index: 1, kind: input, shape index: {}]   ;;  %s684_s2 = inlined_call_operand.vmem [shape: f32[16,1], index: 2, kind: input, shape index: {}]   ;;  %s685_s3 = inlined_call_operand.vmem [shape: bf16[16,384], index: 3, kind: output, shape index: {}]  }
   0x1   :  { %s605_s14 = smov 0   ;;  %s607_s15 = smov 0  }
   0x2   :  { %s609_s16 = smov 0  }
   0x3 LB: > { %s25_s17 = sadd.s32 1, %s574_s15  ;;  %s463_s18 = sadd.s32 4294967295, %s578_s16   ;;  %s578_s16 = sphi %s609_s16, %s13_s16   ;;  %s574_s15 = sphi %s607_s15, %s690_s15   ;;  %s570_s14 = sphi %s605_s14, %s689_s14   ;;  %s566_s13 = sphi %s603_s13, %s688_s13   ;;  %s562_s12 = sphi %s601_s12, %s687_s12  }
   0x4   : > { %p27_p0 = scmp.ge.s32.totalorder %s25_s17, 3  ;;  %p67_p1 = scmp.ne.s32.totalorder %s566_s13, %s562_s12 }
   0x5   : > { %p68_p2 = scmp.eq.s32.totalorder %s578_s16, 0  ;;  %p118_p4 = scmp.eq.s32.totalorder %s463_s18, 2 }
   0x6   : > { %s692_s17 = smov (%p27_p0, %s25_s17), 0  ;;  %s60_s20 = sadd.s32 1, %s566_s13 }
   0x7   : > { %p69_p3 = por %p68_p2, %p67_p1  ;;  %s56_s19 = ssub.s32 %s574_s15, %s692_s17 }
   0x8   : > { %p58_p5 = scmp.eq.s32.totalorder %s56_s19, 0  ;;  %p636_p6 = por %p118_p4, %p67_p1 }
   0x9   : > { %p467_p7 = scmp.ge.s32.totalorder %s578_s16, 3 }
   0xa   : > { %s641_s22 = scalar_select %p58_p5, %s566_s13, %s60_s20  }
   0xb   : > { %150 = sbr.rel (%p467_p7) target bundleno = 26 (0x1a), region = 24 }
  0x10   : > { %153 = sbr.rel (!%p69_p3) target bundleno = 26 (0x1a), region = 28  ;;  %s155_s23 = sand.u32 (%p69_p3), 1, %s566_s13  }
  0x11   : > { %s468_s24 = sshll.u32 (%p69_p3), %s574_s15, 2  ;;  %s496_s25 = smul.u32 (%p69_p3), 20, %s155_s23 }
  0x12   : > { %s162_s28 = scalar_lea.vmem (%p69_p3), %s683_s1, %s468_s24 }
  0x13   : > { %v179_v0 = vld [vmem:[%s162_s28] sm:$0xf] (%p69_p3)  ;;  %v181_v1 = vld [vmem:[%s162_s28 + $0xc] sm:$0xf] (%p69_p3)  ;;  %v183_v2 = vld [vmem:[%s162_s28 + $0x18] sm:$0xf] (%p69_p3) }
  0x14   : > { %s157_s29 = scalar_lea.vmem (%p69_p3), [#allocation2], %s496_s25  ;;  %v185_v3 = vld [vmem:[%s162_s28 + $0x24] sm:$0xf] (%p69_p3)  ;;  %v187_v4 = vld [vmem:[%s162_s28 + $0x30] sm:$0xf] (%p69_p3) }
  0x15   : > { %180 = vst [vmem:[%s157_s29] sm:$0xf] %v179_v0 }
  0x16   : > { %182 = vst [vmem:[%s157_s29 + $0x4] sm:$0xf] %v181_v1 }
  0x17   : > { %184 = vst [vmem:[%s157_s29 + $0x8] sm:$0xf] %v183_v2 }
  0x18   : > { %186 = vst [vmem:[%s157_s29 + $0xc] sm:$0xf] %v185_v3 }
  0x19   : > { %188 = vst [vmem:[%s157_s29 + $0x10] sm:$0xf] %v187_v4 }
  0x1a PF: > { %p469_p8 = scmp.ge.s32.totalorder %s578_s16, 1  ;;  %p221_p9 = scmp.lt.s32.totalorder %s578_s16, 4 }
  0x1c   : > { %p222_p10 = pnand %p469_p8, %p221_p9 }
  0x1d   : > { %s228_s30 = sand.u32 (!%p222_p10), 1, %s562_s12  }
  0x1e   : > { %225 = sbr.rel (%p222_p10) target bundleno = 203 (0xcb), region = 69  ;;  %s470_s12 = sshll.u32 (!%p222_p10), %s228_s30, 3 }
  0x1f   : > { %s497_s6 = smul.u32 (!%p222_p10), 20, %s228_s30  ;;  %s253_s18 = scalar_lea.vmem (!%p222_p10), [#allocation3], %s470_s12 }
  0x21   : > { %s230_s7 = scalar_lea.vmem (!%p222_p10), [#allocation2], %s497_s6 }
  0x23   : > { %v267_v5 = vld [vmem:[%s684_s2] sm:$0xff]  ;;  %v580_v6 = vmov 0   ;;  %vm303_vm0 = vcmask 1041408   ;;  %v268_v10 = vld [vmem:[%s684_s2 + $0x8] sm:$0xff]  ;;  %vm299_vm1 = vcmask 293888   ;;  %s485_s19 = sshll.u32 (%p636_p6), %s570_s14, 2 }
  0x24   : > { %539 = vset.pattern.permute.xlu0 %v580_v6  ;;  %v266_v7 = vld [vmem:[%s230_s7 + $0x10] sm:$0x3]  ;;  %v490_v12 = vld [vmem:[%s230_s7 + $0x8] sm:$0xff]  ;;  %v489_v13 = vld [vmem:[%s230_s7] sm:$0xff]  ;;  %s335_s24 = scalar_lea.vmem (%p636_p6), %s685_s3, %s485_s19 }
  0x25   : > { %271 = vperm.xlu0 %539, %v267_v5   ;;  %v293_v8 = vunpack.c.l.b16 %v266_v7  ;;  %v488_v14 = vld [vmem:[%s682_s0] sm:$0xff] }
  0x27   : > { %v296_v9 = vpack.c.b16 %v293_v8, %v293_v8 }
  0x29   : > { %v305_v11 = vsel %vm303_vm0, %v296_v9, 0 }
  0x2a   : > { %312 = vmatpush.bf16.msra.mxu0 %v305_v11 }
  0x2d   : > { %276 = vperm.xlu0 %539, %v268_v10  }
  0x2e   : > { %313 = vmatpush.bf16.msra.mxu0 %v490_v12 }
  0x32   : > { %314 = vmatpush.bf16.msra.mxu0 %v489_v13 }
  0x35   : > { %483 = vmatmul.msk.bf16.vlgmr.msra.gmra.mxu0 %vm299_vm1, %v488_v14 }
  0x97   : > { %v272_v15 = vpop.permute.xlu0 %271 }
  0x9f   : > { %v277_v18 = vpop.permute.xlu0 %276 }
  0xb2   : > { %v316_v16 = vpop.f32.mrf.mxu0 }
  0xb3   : > { %v317_v17 = vadd.f32 %v316_v16, %v272_v15 }
  0xb5   : > { %v321_v21 = vmax.f32 %v317_v17, 0.0 }
  0xba   : > { %v318_v19 = vpop.f32.mrf.mxu0 }
  0xbb   : > { %v319_v20 = vadd.f32 %v318_v19, %v277_v18 }
  0xbd   : > { %v322_v22 = vmax.f32 %v319_v20, 0.0  ;;  %333 = sbr.rel (!%p636_p6) target bundleno = 203 (0xcb), region = 77 }
  0xbf   : > { %v494_v23 = vpack.c.bf16 %v322_v22, %v321_v21 }
  0xc1   : > { %495 = vst [vmem:[%s253_s18] sm:$0xff] %v494_v23  }
  0xc8   : > { %v352_v24 = vld [vmem:[%s253_s18] sm:$0xf]  ;;  %v354_v25 = vld [vmem:[%s253_s18 + $0x4] sm:$0xf] }
  0xc9   : > { %353 = vst [vmem:[%s335_s24] sm:$0xf] %v352_v24 }
  0xca   : > { %355 = vst [vmem:[%s335_s24 + $0xc] sm:$0xf] %v354_v25 }
  0xcb PF: > { %s13_s16 = sadd.s32 1, %s578_s16   ;;  %s687_s12 = smov %s566_s13 }
  0xcc   : > { %p10_p11 = scmp.ge.s32.totalorder %s13_s16, 5   ;;  %s688_s13 = smov %s641_s22 }
  0xcd   : > { %s689_s14 = smov %s574_s15  ;;  %s690_s15 = smov %s692_s17 }
  0xce   :  { %12 = sbr.rel (!%p10_p11) target bundleno = 3 (0x3), region = 152 }

// kernel: triplet_autoencoder_forward.6
= control target key start
LH: loop header
LB: loop body
LE: loop exit
PB: predicated region body
PF: predicated region fallthrough
CT: control target
= control target key end

     0   :  { %v273_v6 = vmov 0   ;;  %vm133_vm0 = vcmask 130048   ;;  %vm186_vm1 = vcmask 781312   ;;  %s375_s1 = inlined_call_operand.vmem [shape: bf16[144,96], index: 1, kind: input, shape index: {}]   ;;  %s376_s0 = inlined_call_operand.vmem [shape: bf16[32,144], index: 0, kind: input, shape index: {}]   ;;  %s377_s2 = inlined_call_operand.vmem [shape: f32[32,1], index: 2, kind: input, shape index: {}]   ;;  %s378_s3 = inlined_call_operand.vmem [shape: bf16[32,96], index: 3, kind: output, shape index: {}]  }
   0x1   :  { %v260_v0 = vld [vmem:[%s375_s1 + $0x38] sm:$0xff]  ;;  %v261_v1 = vld [vmem:[%s375_s1 + $0x40] sm:$0xff]  ;;  %v259_v3 = vld [vmem:[%s375_s1 + $0x30] sm:$0xff]  ;;  %272 = vset.pattern.permute.xlu1 %v273_v6  ;;  %271 = vset.pattern.permute.xlu0 %v273_v6 }
   0x2   :  { %v249_v2 = vld [vmem:[%s376_s0 + $0x4] sm:$0xf]  ;;  %140 = vmatpush.bf16.msra.mxu0 %v260_v0  ;;  %262 = vmatpush.bf16.msra.mxu2 %v260_v0  ;;  %v199_v4 = vld [vmem:[%s376_s0 + $0x8] sm:$0xf0]  ;;  %v39_v7 = vld [vmem:[%s377_s2 + $0x10] sm:$0xff] }
   0x3   :  { %166 = vmatpush.bf16.msra.mxu1 %v261_v1  ;;  %v202_v5 = vor.u32 %v249_v2, %v199_v4  ;;  %v258_v8 = vld [vmem:[%s375_s1 + $0x28] sm:$0xff]  ;;  %v37_v9 = vld [vmem:[%s377_s2] sm:$0xff]  ;;  %53 = vperm.xlu1 %272, %v39_v7   ;;  %v40_v11 = vld [vmem:[%s377_s2 + $0x18] sm:$0xff] }
   0x4   :  { %43 = vperm.xlu0 %271, %v37_v9   ;;  %v257_v10 = vld [vmem:[%s375_s1 + $0x20] sm:$0xff]  ;;  %v38_v12 = vld [vmem:[%s377_s2 + $0x8] sm:$0xff]  ;;  %v256_v13 = vld [vmem:[%s375_s1 + $0x18] sm:$0xff] }
   0x5   :  { %v251_v14 = vld [vmem:[%s376_s0 + $0x14] sm:$0xf]  ;;  %v207_v15 = vld [vmem:[%s376_s0 + $0x18] sm:$0xf0]  ;;  %v254_v18 = vld [vmem:[%s375_s1 + $0x8] sm:$0xff] }
   0x6   :  { %141 = vmatpush.bf16.msra.mxu0 %v259_v3  ;;  %263 = vmatpush.bf16.msra.mxu2 %v259_v3  ;;  %v255_v16 = vld [vmem:[%s375_s1 + $0x10] sm:$0xff]  ;;  %v210_v17 = vor.u32 %v251_v14, %v207_v15  ;;  %v253_v19 = vld [vmem:[%s375_s1] sm:$0xff]  ;;  %v250_v21 = vld [vmem:[%s376_s0 + $0x4] sm:$0xf0] }
   0x7   :  { %247 = vmatmul.msk.bf16.vlgmr.msra.gmra.mxu1 %vm133_vm0, %v202_v5  ;;  %v197_v20 = vld [vmem:[%s376_s0] sm:$0xf]  ;;  %v205_v22 = vld [vmem:[%s376_s0 + $0x10] sm:$0xf]  ;;  %v252_v23 = vld [vmem:[%s376_s0 + $0x14] sm:$0xf0] }
   0x8   :  { %v198_v24 = vor.u32 %v250_v21, %v197_v20  ;;  %v206_v25 = vor.u32 %v252_v23, %v205_v22 }
   0xa   :  { %142 = vmatpush.bf16.msra.mxu0 %v258_v8  ;;  %264 = vmatpush.bf16.msra.mxu2 %v258_v8 }
   0xb   :  { %58 = vperm.xlu1 %272, %v40_v11  }
   0xc   :  { %48 = vperm.xlu0 %271, %v38_v12  }
   0xe   :  { %143 = vmatpush.bf16.msra.mxu0 %v257_v10  ;;  %265 = vmatpush.bf16.msra.mxu2 %v257_v10 }
  0x12   :  { %144 = vmatpush.bf16.msra.mxu0 %v256_v13  ;;  %266 = vmatpush.bf16.msra.mxu2 %v256_v13 }
  0x16   :  { %145 = vmatpush.bf16.msra.mxu0 %v255_v16  ;;  %267 = vmatpush.bf16.msra.mxu2 %v255_v16 }
  0x17   :  { %248 = vmatmul.msk.bf16.gmra.mxu1 %vm133_vm0, %v210_v17 }
  0x1a   :  { %146 = vmatpush.bf16.msra.mxu0 %v254_v18  ;;  %268 = vmatpush.bf16.msra.mxu2 %v254_v18 }
  0x1e   :  { %147 = vmatpush.bf16.msra.mxu0 %v253_v19  ;;  %269 = vmatpush.bf16.msra.mxu2 %v253_v19 }
  0x21   :  { %148 = vmatmul.bf16.vlgmr.msra.gmra.mxu0 %v198_v24  ;;  %153 = vmatmul.bf16.vlgmr.msra.gmra.mxu2 %v206_v25 }
  0x75   :  { %v54_v32 = vpop.permute.xlu1 %53 }
  0x76   :  { %v44_v28 = vpop.permute.xlu0 %43 }
  0x7d   :  { %v59_v46 = vpop.permute.xlu1 %58 }
  0x7e   :  { %v49_v38 = vpop.permute.xlu0 %48 }
  0x84   :  { %v168_v26 = vpop.f32.mrf.mxu1 }
  0x8c   :  { %v170_v27 = vpop.f32.mrf.mxu1 }
  0x94   :  { %v173_v34 = vpop.f32.mrf.mxu1 }
  0x9c   :  { %v175_v50 = vpop.f32.mrf.mxu1 }
  0x9e   :  { %v149_v29 = vpop.f32.mrf.mxu0 }
  0x9f   :  { %v150_v30 = vadd.f32 %v149_v29, %v44_v28 }
  0xa1   :  { %v169_v31 = vadd.f32 %v168_v26, %v150_v30 }
  0xa3   :  { %v178_v33 = vmax.f32 %v169_v31, 0.0 }
  0xa4   :  { %v154_v35 = vpop.f32.mrf.mxu2 }
  0xa5   :  { %v182_v36 = vpack.c.bf16 %v178_v33, %v178_v33  ;;  %v155_v37 = vadd.f32 %v154_v35, %v54_v32 }
  0xa6   :  { %v151_v39 = vpop.f32.mrf.mxu0 }
  0xa7   :  { %187 = vst.msk [vmem:[%s378_s3] sm:$0xf] %vm186_vm1, %v182_v36  ;;  %v174_v40 = vadd.f32 %v173_v34, %v155_v37  ;;  %v152_v41 = vadd.f32 %v151_v39, %v49_v38 }
  0xa9   :  { %v180_v42 = vmax.f32 %v174_v40, 0.0  ;;  %v171_v43 = vadd.f32 %v170_v27, %v152_v41 }
  0xab   :  { %v184_v44 = vpack.c.bf16 %v180_v42, %v180_v42  ;;  %v179_v45 = vmax.f32 %v171_v43, 0.0 }
  0xac   :  { %v156_v47 = vpop.f32.mrf.mxu2 }
  0xad   :  { %189 = vst.msk [vmem:[%s378_s3 + $0x8] sm:$0xf] %vm186_vm1, %v184_v44  ;;  %v183_v48 = vpack.c.bf16 %v179_v45, %v179_v45  ;;  %v157_v49 = vadd.f32 %v156_v47, %v59_v46 }
  0xaf   :  { %188 = vst.msk [vmem:[%s378_s3 + $0x4] sm:$0xf] %vm186_vm1, %v183_v48  ;;  %v176_v51 = vadd.f32 %v175_v50, %v157_v49 }
  0xb1   :  { %v181_v52 = vmax.f32 %v176_v51, 0.0 }
  0xb3   :  { %v185_v53 = vpack.c.bf16 %v181_v52, %v181_v52 }
  0xb5   :  { %190 = vst.msk [vmem:[%s378_s3 + $0xc] sm:$0xf] %vm186_vm1, %v185_v53 }

// kernel: triplet_autoencoder_forward.7
= control target key start
LH: loop header
LB: loop body
LE: loop exit
PB: predicated region body
PF: predicated region fallthrough
CT: control target
= control target key end

     0   :  { %vm351_vm0 = vcmask 259072   ;;  %vm412_vm1 = vcmask 261120   ;;  %s889_s1 = inlined_call_operand.vmem [shape: bf16[512,32], index: 1, kind: input, shape index: {}]   ;;  %s890_s2 = inlined_call_operand.vmem [shape: f32[1,32], index: 2, kind: input, shape index: {}]   ;;  %s891_s0 = inlined_call_operand.vmem [shape: bf16[6,512], index: 0, kind: input, shape index: {}]   ;;  %s892_s3 = inlined_call_operand.vmem [shape: bf16[32,512], index: 3, kind: input, shape index: {}]   ;;  %s893_s5 = inlined_call_operand.vmem [shape: f32[6,32], index: 5, kind: output, shape index: {0}]   ;;  %s894_s4 = inlined_call_operand.vmem [shape: f32[1,512], index: 4, kind: input, shape index: {}]   ;;  %s895_s6 = inlined_call_operand.vmem [shape: bf16[6,512], index: 6, kind: output, shape index: {1}]  }
   0x1   :  { %v655_v0 = vld [vmem:[%s889_s1 + $0x38] sm:$0xff]  ;;  %v654_v4 = vld [vmem:[%s889_s1 + $0x30] sm:$0xff]  ;;  %v653_v8 = vld [vmem:[%s889_s1 + $0x28] sm:$0xff] }
   0x2   :  { %v663_v1 = vld [vmem:[%s889_s1 + $0x78] sm:$0xff]  ;;  %299 = vmatpush.bf16.msra.mxu0 %v655_v0  ;;  %v662_v5 = vld [vmem:[%s889_s1 + $0x70] sm:$0xff]  ;;  %v661_v9 = vld [vmem:[%s889_s1 + $0x68] sm:$0xff] }
   0x3   :  { %v671_v2 = vld [vmem:[%s889_s1 + $0xb8] sm:$0xff]  ;;  %312 = vmatpush.bf16.msra.mxu1 %v663_v1  ;;  %v670_v6 = vld [vmem:[%s889_s1 + $0xb0] sm:$0xff]  ;;  %v669_v10 = vld [vmem:[%s889_s1 + $0xa8] sm:$0xff] }
   0x4   :  { %v679_v3 = vld [vmem:[%s889_s1 + $0xf8] sm:$0xff]  ;;  %325 = vmatpush.bf16.msra.mxu2 %v671_v2  ;;  %v678_v7 = vld [vmem:[%s889_s1 + $0xf0] sm:$0xff]  ;;  %v677_v11 = vld [vmem:[%s889_s1 + $0xe8] sm:$0xff] }
   0x5   :  { %338 = vmatpush.bf16.msra.mxu3 %v679_v3  ;;  %v652_v12 = vld [vmem:[%s889_s1 + $0x20] sm:$0xff]  ;;  %v651_v16 = vld [vmem:[%s889_s1 + $0x18] sm:$0xff]  ;;  %v650_v20 = vld [vmem:[%s889_s1 + $0x10] sm:$0xff] }
   0x6   :  { %300 = vmatpush.bf16.msra.mxu0 %v654_v4  ;;  %v660_v13 = vld [vmem:[%s889_s1 + $0x60] sm:$0xff]  ;;  %v659_v17 = vld [vmem:[%s889_s1 + $0x58] sm:$0xff]  ;;  %v658_v21 = vld [vmem:[%s889_s1 + $0x50] sm:$0xff] }
   0x7   :  { %313 = vmatpush.bf16.msra.mxu1 %v662_v5  ;;  %v668_v14 = vld [vmem:[%s889_s1 + $0xa0] sm:$0xff]  ;;  %v667_v18 = vld [vmem:[%s889_s1 + $0x98] sm:$0xff]  ;;  %v666_v22 = vld [vmem:[%s889_s1 + $0x90] sm:$0xff] }
   0x8   :  { %326 = vmatpush.bf16.msra.mxu2 %v670_v6  ;;  %v676_v15 = vld [vmem:[%s889_s1 + $0xe0] sm:$0xff]  ;;  %v675_v19 = vld [vmem:[%s889_s1 + $0xd8] sm:$0xff]  ;;  %v674_v23 = vld [vmem:[%s889_s1 + $0xd0] sm:$0xff] }
   0x9   :  { %339 = vmatpush.bf16.msra.mxu3 %v678_v7  ;;  %v649_v24 = vld [vmem:[%s889_s1 + $0x8] sm:$0xff]  ;;  %v23_v26 = vld [vmem:[%s891_s0] sm:$0x77]  ;;  %v687_v33 = vld [vmem:[%s892_s3 + $0x34] sm:$0xf0] }
   0xa   :  { %301 = vmatpush.bf16.msra.mxu0 %v653_v8  ;;  %v657_v25 = vld [vmem:[%s889_s1 + $0x48] sm:$0xff]  ;;  %v95_v31 = vunpack.c.l.b16 %v23_v26  ;;  %v96_v32 = vunpack.c.h.b16 %v23_v26  ;;  %v640_v35 = vld [vmem:[%s892_s3 + $0x38] sm:$0xf0]  ;;  %v648_v36 = vld [vmem:[%s889_s1] sm:$0xff] }
   0xb   :  { %314 = vmatpush.bf16.msra.mxu1 %v661_v9  ;;  %v665_v27 = vld [vmem:[%s889_s1 + $0x88] sm:$0xff]  ;;  %v656_v37 = vld [vmem:[%s889_s1 + $0x40] sm:$0xff]  ;;  %v686_v49 = vld [vmem:[%s892_s3 + $0x2c] sm:$0xf0] }
   0xc   :  { %327 = vmatpush.bf16.msra.mxu2 %v669_v10  ;;  %v673_v28 = vld [vmem:[%s889_s1 + $0xc8] sm:$0xff]  ;;  %v664_v40 = vld [vmem:[%s889_s1 + $0x80] sm:$0xff]  ;;  %v99_v44 = vpack.c.b16 %v95_v31, %v95_v31  ;;  %v100_v45 = vpack.c.b16 %v96_v32, %v96_v32  ;;  %v632_v52 = vld [vmem:[%s892_s3 + $0x30] sm:$0xf0] }
   0xd   :  { %340 = vmatpush.bf16.msra.mxu3 %v677_v11  ;;  %v24_v29 = vld [vmem:[%s891_s0 + $0x8] sm:$0x77]  ;;  %v672_v41 = vld [vmem:[%s889_s1 + $0xc0] sm:$0xff]  ;;  %v683_v54 = vld [vmem:[%s892_s3 + $0x14] sm:$0xf0] }
   0xe   :  { %302 = vmatpush.bf16.msra.mxu0 %v652_v12  ;;  %v638_v30 = vld [vmem:[%s892_s3 + $0x28] sm:$0xf]  ;;  %v685_v34 = vld [vmem:[%s892_s3 + $0x2c] sm:$0xf]  ;;  %v97_v38 = vunpack.c.l.b16 %v24_v29  ;;  %v98_v39 = vunpack.c.h.b16 %v24_v29  ;;  %v630_v48 = vld [vmem:[%s892_s3 + $0x20] sm:$0xf] }
   0xf   :  { %315 = vmatpush.bf16.msra.mxu1 %v660_v13  ;;  %v639_v42 = vor.u32 %v687_v33, %v638_v30  ;;  %v643_v43 = vor.u32 %v685_v34, %v640_v35  ;;  %v684_v50 = vld [vmem:[%s892_s3 + $0x24] sm:$0xf]  ;;  %v631_v51 = vor.u32 %v686_v49, %v630_v48  ;;  %v622_v53 = vld [vmem:[%s892_s3 + $0x8] sm:$0xf]  ;;  %v681_v57 = vld [vmem:[%s892_s3 + $0xc] sm:$0xf] }
  0x10   :  { %328 = vmatpush.bf16.msra.mxu2 %v668_v14  ;;  %v101_v46 = vpack.c.b16 %v97_v38, %v97_v38  ;;  %v102_v47 = vpack.c.b16 %v98_v39, %v98_v39  ;;  %v635_v55 = vor.u32 %v684_v50, %v632_v52  ;;  %v623_v56 = vor.u32 %v683_v54, %v622_v53  ;;  %v624_v58 = vld [vmem:[%s892_s3 + $0x18] sm:$0xf0]  ;;  %v614_v60 = vld [vmem:[%s892_s3] sm:$0xf]  ;;  %v682_v61 = vld [vmem:[%s892_s3 + $0xc] sm:$0xf0] }
  0x11   :  { %341 = vmatpush.bf16.msra.mxu3 %v676_v15  ;;  %v627_v59 = vor.u32 %v681_v57, %v624_v58  ;;  %v680_v62 = vld [vmem:[%s892_s3 + $0x4] sm:$0xf]  ;;  %v615_v63 = vor.u32 %v682_v61, %v614_v60  ;;  %v616_v0 = vld [vmem:[%s892_s3 + $0x10] sm:$0xf0]  ;;  %v688_v2 = vld [vmem:[%s890_s2] ss:$0 sm:$0xff] }
  0x12   :  { %303 = vmatpush.bf16.msra.mxu0 %v651_v16  ;;  %v619_v1 = vor.u32 %v680_v62, %v616_v0  ;;  %v362_v16 = vld [vmem:[%s894_s4] sm:$0xf] }
  0x13   :  { %316 = vmatpush.bf16.msra.mxu1 %v659_v17  ;;  %v364_v17 = vperm.slane %v362_v16, 0  ;;  %v367_v26 = vperm.slane %v362_v16, 3 }
  0x14   :  { %329 = vmatpush.bf16.msra.mxu2 %v667_v18  ;;  %v365_v18 = vperm.slane %v362_v16, 1 }
  0x15   :  { %342 = vmatpush.bf16.msra.mxu3 %v675_v19 }
  0x16   :  { %304 = vmatpush.bf16.msra.mxu0 %v650_v20 }
  0x17   :  { %317 = vmatpush.bf16.msra.mxu1 %v658_v21 }
  0x18   :  { %330 = vmatpush.bf16.msra.mxu2 %v666_v22 }
  0x19   :  { %343 = vmatpush.bf16.msra.mxu3 %v674_v23 }
  0x1a   :  { %305 = vmatpush.bf16.msra.mxu0 %v649_v24 }
  0x1b   :  { %318 = vmatpush.bf16.msra.mxu1 %v657_v25  ;;  %v366_v25 = vperm.slane %v362_v16, 2 }
  0x1c   :  { %331 = vmatpush.bf16.msra.mxu2 %v665_v27 }
  0x1d   :  { %344 = vmatpush.bf16.msra.mxu3 %v673_v28 }
  0x1e   :  { %306 = vmatpush.bf16.msra.mxu0 %v648_v36 }
  0x1f   :  { %319 = vmatpush.bf16.msra.mxu1 %v656_v37 }
  0x20   :  { %332 = vmatpush.bf16.msra.mxu2 %v664_v40 }
  0x21   :  { %345 = vmatpush.bf16.msra.mxu3 %v672_v41  ;;  %307 = vmatmul.bf16.vlgmr.msra.gmra.mxu0 %v99_v44 }
  0x22   :  { %320 = vmatmul.bf16.vlgmr.msra.gmra.mxu1 %v100_v45  ;;  %422 = vmatpush.bf16.msrb.mxu0 %v631_v51 }
  0x23   :  { %333 = vmatmul.bf16.vlgmr.msra.gmra.mxu2 %v101_v46  ;;  %435 = vmatpush.bf16.msrb.mxu1 %v635_v55 }
  0x24   :  { %448 = vmatpush.bf16.msrb.mxu2 %v639_v42  ;;  %346 = vmatmul.bf16.vlgmr.msra.gmra.mxu3 %v102_v47 }
  0x25   :  { %461 = vmatpush.bf16.msrb.mxu3 %v643_v43 }
  0x26   :  { %423 = vmatpush.bf16.msrb.mxu0 %v615_v63 }
  0x27   :  { %436 = vmatpush.bf16.msrb.mxu1 %v619_v1 }
  0x28   :  { %449 = vmatpush.bf16.msrb.mxu2 %v623_v56 }
  0x29   :  { %462 = vmatpush.bf16.msrb.mxu3 %v627_v59 }
  0x9e   :  { %v308_v3 = vpop.f32.mrf.mxu0 }
  0x9f   :  { %v321_v4 = vpop.f32.mrf.mxu1  ;;  %v309_v5 = vadd.f32 %v688_v2, %v308_v3 }
  0xa1   :  { %v322_v6 = vadd.f32 %v321_v4, %v309_v5 }
  0xa6   :  { %v334_v7 = vpop.f32.mrf.mxu2  ;;  %v310_v10 = vpop.f32.mrf.mxu0 }
  0xa7   :  { %v347_v8 = vpop.f32.mrf.mxu3  ;;  %v335_v9 = vadd.f32 %v334_v7, %v322_v6  ;;  %v323_v11 = vpop.f32.mrf.mxu1 }
  0xa9   :  { %v348_v12 = vadd.f32 %v347_v8, %v335_v9 }
  0xab   :  { %352 = vst.msk [vmem:[%s893_s5] sm:$0x3f] %vm351_vm0, %v348_v12  ;;  %v353_v13 = vpack.c.bf16 %v348_v12, %v348_v12 }
  0xad   :  { %644 = vmatmul.msk.bf16.vlgmr.msrb.gmra.mxu0 %vm412_vm1, %v353_v13  ;;  %645 = vmatmul.msk.bf16.vlgmr.msrb.gmra.mxu1 %vm412_vm1, %v353_v13 }
  0xae   :  { %646 = vmatmul.msk.bf16.vlgmr.msrb.gmra.mxu2 %vm412_vm1, %v353_v13  ;;  %647 = vmatmul.msk.bf16.vlgmr.msrb.gmra.mxu3 %vm412_vm1, %v353_v13  ;;  %v336_v14 = vpop.f32.mrf.mxu2 }
  0xaf   :  { %v349_v15 = vpop.f32.mrf.mxu3 }
 0x12a   :  { %v425_v19 = vpop.f32.mrf.mxu0  ;;  %v438_v20 = vpop.f32.mrf.mxu1 }
 0x12b   :  { %v426_v21 = vadd.f32 %v425_v19, %v364_v17  ;;  %v439_v22 = vadd.f32 %v438_v20, %v365_v18 }
 0x12d   :  { %v468_v23 = vmax.f32 %v426_v21, 0.0  ;;  %v469_v24 = vmax.f32 %v439_v22, 0.0 }
 0x12f   :  { %v472_v27 = vpack.c.bf16 %v469_v24, %v468_v23 }
 0x131   :  { %474 = vst [vmem:[%s895_s6] sm:$0x77] %v472_v27  ;;  %v451_v28 = vpop.f32.mrf.mxu2  ;;  %v464_v29 = vpop.f32.mrf.mxu3 }
 0x132   :  { %v452_v30 = vadd.f32 %v451_v28, %v366_v25  ;;  %v465_v31 = vadd.f32 %v464_v29, %v367_v26  ;;  %v427_v32 = vpop.f32.mrf.mxu0  ;;  %v440_v33 = vpop.f32.mrf.mxu1 }
 0x134   :  { %v470_v34 = vmax.f32 %v452_v30, 0.0  ;;  %v471_v35 = vmax.f32 %v465_v31, 0.0 }
 0x136   :  { %v473_v36 = vpack.c.bf16 %v471_v35, %v470_v34 }
 0x138   :  { %475 = vst [vmem:[%s895_s6 + $0x8] sm:$0x77] %v473_v36 }
 0x139   :  { %v453_v37 = vpop.f32.mrf.mxu2  ;;  %v466_v38 = vpop.f32.mrf.mxu3 }

// kernel: triplet_autoencoder_forward.8
= control target key start
LH: loop header
LB: loop body
LE: loop exit
PB: predicated region body
PF: predicated region fallthrough
CT: control target
= control target key end

     0   :  { %v222_v0 = vmov 0   ;;  %vm107_vm0 = vcmask 261120   ;;  %vm165_vm1 = vcmask 781312   ;;  %s317_s2 = inlined_call_operand.vmem [shape: f32[64,1], index: 2, kind: input, shape index: {}]   ;;  %s318_s1 = inlined_call_operand.vmem [shape: bf16[32,96], index: 1, kind: input, shape index: {}]   ;;  %s319_s0 = inlined_call_operand.vmem [shape: bf16[64,32], index: 0, kind: input, shape index: {}]   ;;  %s320_s3 = inlined_call_operand.vmem [shape: bf16[64,96], index: 3, kind: output, shape index: {}]  }
   0x1   :  { %220 = vset.pattern.permute.xlu1 %v222_v0  ;;  %219 = vset.pattern.permute.xlu0 %v222_v0  ;;  %v29_v1 = vld [vmem:[%s317_s2 + $0x10] sm:$0xff]  ;;  %v27_v2 = vld [vmem:[%s317_s2] sm:$0xff]  ;;  %v211_v3 = vld [vmem:[%s318_s1 + $0x8] sm:$0xff] }
   0x2   :  { %47 = vperm.xlu1 %220, %v29_v1   ;;  %37 = vperm.xlu0 %219, %v27_v2   ;;  %v210_v4 = vld [vmem:[%s318_s1] sm:$0xff]  ;;  %v207_v7 = vld [vmem:[%s319_s0 + $0x8] sm:$0xff]  ;;  %v208_v8 = vld [vmem:[%s319_s0 + $0x10] sm:$0xff] }
   0x3   :  { %126 = vmatpush.bf16.msra.mxu0 %v211_v3  ;;  %212 = vmatpush.bf16.msra.mxu1 %v211_v3  ;;  %v31_v5 = vld [vmem:[%s317_s2 + $0x20] sm:$0xff]  ;;  %v209_v9 = vld [vmem:[%s319_s0 + $0x18] sm:$0xff]  ;;  %v28_v11 = vld [vmem:[%s317_s2 + $0x8] sm:$0xff] }
   0x4   :  { %213 = vmatpush.bf16.msra.mxu2 %v211_v3  ;;  %214 = vmatpush.bf16.msra.mxu3 %v211_v3  ;;  %v206_v6 = vld [vmem:[%s319_s0] sm:$0xff]  ;;  %v30_v10 = vld [vmem:[%s317_s2 + $0x18] sm:$0xff]  ;;  %v32_v12 = vld [vmem:[%s317_s2 + $0x28] sm:$0xff] }
   0x5   :  { %221 = vset.pattern.permute.xlu2 %v222_v0  ;;  %v34_v13 = vld [vmem:[%s317_s2 + $0x38] sm:$0xff]  ;;  %v33_v14 = vld [vmem:[%s317_s2 + $0x30] sm:$0xff] }
   0x6   :  { %57 = vperm.xlu2 %221, %v31_v5  }
   0x7   :  { %127 = vmatpush.bf16.msra.mxu0 %v210_v4  ;;  %215 = vmatpush.bf16.msra.mxu1 %v210_v4 }
   0x8   :  { %216 = vmatpush.bf16.msra.mxu2 %v210_v4  ;;  %217 = vmatpush.bf16.msra.mxu3 %v210_v4 }
   0xa   :  { %202 = vmatmul.msk.bf16.vlgmr.msra.gmra.mxu0 %vm107_vm0, %v206_v6  ;;  %203 = vmatmul.msk.bf16.vlgmr.msra.gmra.mxu1 %vm107_vm0, %v207_v7 }
   0xb   :  { %204 = vmatmul.msk.bf16.vlgmr.msra.gmra.mxu2 %vm107_vm0, %v208_v8  ;;  %205 = vmatmul.msk.bf16.vlgmr.msra.gmra.mxu3 %vm107_vm0, %v209_v9 }
   0xc   :  { %52 = vperm.xlu1 %220, %v30_v10   ;;  %42 = vperm.xlu0 %219, %v28_v11  }
   0xe   :  { %62 = vperm.xlu2 %221, %v32_v12  }
  0x14   :  { %72 = vperm.xlu1 %220, %v34_v13   ;;  %67 = vperm.xlu0 %219, %v33_v14  }
  0x60   :  { %v58_v25 = vpop.permute.xlu2 %57 }
  0x68   :  { %v63_v46 = vpop.permute.xlu2 %62 }
  0x74   :  { %v38_v15 = vpop.permute.xlu0 %37  ;;  %v48_v16 = vpop.permute.xlu1 %47 }
  0x7e   :  { %v43_v17 = vpop.permute.xlu0 %42  ;;  %v53_v24 = vpop.permute.xlu1 %52 }
  0x86   :  { %v68_v28 = vpop.permute.xlu0 %67  ;;  %v73_v45 = vpop.permute.xlu1 %72 }
  0x87   :  { %v129_v18 = vpop.f32.mrf.mxu0  ;;  %v134_v19 = vpop.f32.mrf.mxu1 }
  0x88   :  { %v130_v20 = vadd.f32 %v129_v18, %v38_v15  ;;  %v135_v21 = vadd.f32 %v134_v19, %v48_v16 }
  0x8a   :  { %v149_v22 = vmax.f32 %v130_v20, 0.0  ;;  %v151_v23 = vmax.f32 %v135_v21, 0.0 }
  0x8c   :  { %v157_v26 = vpack.c.bf16 %v149_v22, %v149_v22  ;;  %v159_v27 = vpack.c.bf16 %v151_v23, %v151_v23 }
  0x8e   :  { %166 = vst.msk [vmem:[%s320_s3] sm:$0xf] %vm165_vm1, %v157_v26  ;;  %v139_v29 = vpop.f32.mrf.mxu2  ;;  %v144_v30 = vpop.f32.mrf.mxu3 }
  0x8f   :  { %168 = vst.msk [vmem:[%s320_s3 + $0x8] sm:$0xf] %vm165_vm1, %v159_v27  ;;  %v140_v31 = vadd.f32 %v139_v29, %v58_v25  ;;  %v145_v32 = vadd.f32 %v144_v30, %v68_v28  ;;  %v131_v33 = vpop.f32.mrf.mxu0  ;;  %v136_v34 = vpop.f32.mrf.mxu1 }
  0x90   :  { %v132_v35 = vadd.f32 %v131_v33, %v43_v17  ;;  %v137_v36 = vadd.f32 %v136_v34, %v53_v24 }
  0x91   :  { %v153_v37 = vmax.f32 %v140_v31, 0.0  ;;  %v155_v38 = vmax.f32 %v145_v32, 0.0 }
  0x92   :  { %v150_v39 = vmax.f32 %v132_v35, 0.0  ;;  %v152_v40 = vmax.f32 %v137_v36, 0.0 }
  0x93   :  { %v161_v41 = vpack.c.bf16 %v153_v37, %v153_v37  ;;  %v163_v42 = vpack.c.bf16 %v155_v38, %v155_v38 }
  0x94   :  { %v158_v43 = vpack.c.bf16 %v150_v39, %v150_v39  ;;  %v160_v44 = vpack.c.bf16 %v152_v40, %v152_v40 }
  0x95   :  { %170 = vst.msk [vmem:[%s320_s3 + $0x10] sm:$0xf] %vm165_vm1, %v161_v41 }
  0x96   :  { %172 = vst.msk [vmem:[%s320_s3 + $0x18] sm:$0xf] %vm165_vm1, %v163_v42  ;;  %v141_v47 = vpop.f32.mrf.mxu2  ;;  %v146_v48 = vpop.f32.mrf.mxu3 }
  0x97   :  { %167 = vst.msk [vmem:[%s320_s3 + $0x4] sm:$0xf] %vm165_vm1, %v158_v43  ;;  %v142_v49 = vadd.f32 %v141_v47, %v63_v46  ;;  %v147_v50 = vadd.f32 %v146_v48, %v73_v45 }
  0x98   :  { %169 = vst.msk [vmem:[%s320_s3 + $0xc] sm:$0xf] %vm165_vm1, %v160_v44 }
  0x99   :  { %v154_v51 = vmax.f32 %v142_v49, 0.0  ;;  %v156_v52 = vmax.f32 %v147_v50, 0.0 }
  0x9b   :  { %v162_v53 = vpack.c.bf16 %v154_v51, %v154_v51  ;;  %v164_v54 = vpack.c.bf16 %v156_v52, %v156_v52 }
  0x9d   :  { %171 = vst.msk [vmem:[%s320_s3 + $0x14] sm:$0xf] %vm165_vm1, %v162_v53 }
  0x9e   :  { %173 = vst.msk [vmem:[%s320_s3 + $0x1c] sm:$0xf] %vm165_vm1, %v164_v54 }

// kernel: triplet_autoencoder_forward.9
= control target key start
LH: loop header
LB: loop body
LE: loop exit
PB: predicated region body
PF: predicated region fallthrough
CT: control target
= control target key end

     0   :  { %s569_s12 = smov 0   ;;  %s571_s13 = smov 0   ;;  %s650_s0 = inlined_call_operand.vmem [shape: bf16[16,16], index: 0, kind: input, shape index: {}]   ;;  %s651_s1 = inlined_call_operand.vmem [shape: bf16[16,384], index: 1, kind: input, shape index: {}]   ;;  %s652_s2 = inlined_call_operand.vmem [shape: f32[16,1], index: 2, kind: input, shape index: {}]   ;;  %s653_s3 = inlined_call_operand.vmem [shape: f32[16,384], index: 3, kind: output, shape index: {}]  }
   0x1   :  { %s573_s14 = smov 0   ;;  %s575_s15 = smov 0  }
   0x2   :  { %s577_s16 = smov 0  }
   0x3 LB: > { %s25_s17 = sadd.s32 1, %s542_s15  ;;  %s433_s18 = sadd.s32 4294967295, %s546_s16   ;;  %s546_s16 = sphi %s577_s16, %s13_s16   ;;  %s542_s15 = sphi %s575_s15, %s658_s15   ;;  %s538_s14 = sphi %s573_s14, %s657_s14   ;;  %s534_s13 = sphi %s571_s13, %s656_s13   ;;  %s530_s12 = sphi %s569_s12, %s655_s12  }
   0x4   : > { %p27_p0 = scmp.ge.s32.totalorder %s25_s17, 3  ;;  %p67_p1 = scmp.ne.s32.totalorder %s534_s13, %s530_s12 }
   0x5   : > { %p68_p2 = scmp.eq.s32.totalorder %s546_s16, 0  ;;  %p118_p4 = scmp.eq.s32.totalorder %s433_s18, 2 }
   0x6   : > { %s660_s17 = smov (%p27_p0, %s25_s17), 0  ;;  %s60_s20 = sadd.s32 1, %s534_s13 }
   0x7   : > { %p69_p3 = por %p68_p2, %p67_p1  ;;  %s56_s19 = ssub.s32 %s542_s15, %s660_s17 }
   0x8   : > { %p58_p5 = scmp.eq.s32.totalorder %s56_s19, 0  ;;  %p604_p6 = por %p118_p4, %p67_p1 }
   0x9   : > { %p437_p7 = scmp.ge.s32.totalorder %s546_s16, 3 }
   0xa   : > { %s609_s22 = scalar_select %p58_p5, %s534_s13, %s60_s20  }
   0xb   : > { %150 = sbr.rel (%p437_p7) target bundleno = 22 (0x16), region = 24 }
  0x10   : > { %153 = sbr.rel (!%p69_p3) target bundleno = 22 (0x16), region = 28  ;;  %s155_s23 = sand.u32 (%p69_p3), 1, %s534_s13  }
  0x11   : > { %s439_s24 = sshll.u32 (%p69_p3), %s542_s15, 2  ;;  %s438_s25 = sshll.u32 (%p69_p3), %s155_s23, 3 }
  0x12   : > { %s162_s28 = scalar_lea.vmem (%p69_p3), %s651_s1, %s439_s24  ;;  %s157_s29 = scalar_lea.vmem (%p69_p3), [#allocation2], %s438_s25 }
  0x13   : > { %v179_v0 = vld [vmem:[%s162_s28] sm:$0xf] (%p69_p3)  ;;  %v181_v1 = vld [vmem:[%s162_s28 + $0xc] sm:$0xf] (%p69_p3) }
  0x14   : > { %180 = vst [vmem:[%s157_s29] sm:$0xf] (%p69_p3), %v179_v0 }
  0x15   : > { %182 = vst [vmem:[%s157_s29 + $0x4] sm:$0xf] %v181_v1 }
  0x16 PF: > { %p440_p8 = scmp.ge.s32.totalorder %s546_s16, 1  ;;  %p209_p9 = scmp.lt.s32.totalorder %s546_s16, 4 }
  0x18   : > { %p210_p10 = pnand %p440_p8, %p209_p9 }
  0x19   : > { %s216_s30 = sand.u32 (!%p210_p10), 1, %s530_s12  }
  0x1a   : > { %213 = sbr.rel (%p210_p10) target bundleno = 201 (0xc9), region = 69  ;;  %s441_s6 = sshll.u32 (!%p210_p10), %s216_s30, 3 }
  0x1b   : > { %s218_s7 = scalar_lea.vmem (!%p210_p10), [#allocation2], %s441_s6  ;;  %s442_s12 = sshll.u32 (!%p210_p10), %s216_s30, 4 }
  0x1c   : > { %s241_s18 = scalar_lea.vmem (!%p210_p10), [#allocation3], %s442_s12 }
  0x1f   : > { %v252_v2 = vld [vmem:[%s652_s2] sm:$0xff]  ;;  %v548_v3 = vmov 0   ;;  %vm275_vm0 = vcmask 130048   ;;  %v253_v6 = vld [vmem:[%s652_s2 + $0x8] sm:$0xff]  ;;  %s453_s19 = sshll.u32 (%p604_p6), %s538_s14, 3 }
  0x20   : > { %499 = vset.pattern.permute.xlu0 %v548_v3  ;;  %v457_v4 = vld [vmem:[%s218_s7] sm:$0xff]  ;;  %s313_s24 = scalar_lea.vmem (%p604_p6), %s653_s3, %s453_s19 }
  0x21   : > { %256 = vperm.xlu0 %499, %v252_v2   ;;  %v456_v5 = vld [vmem:[%s650_s0] sm:$0xff]  ;;  %286 = vmatpush.bf16.msra.mxu0 %v457_v4 }
  0x24   : > { %451 = vmatmul.msk.bf16.vlgmr.msra.gmra.mxu0 %vm275_vm0, %v456_v5 }
  0x29   : > { %261 = vperm.xlu0 %499, %v253_v6  }
  0x93   : > { %v257_v7 = vpop.permute.xlu0 %256 }
  0x9b   : > { %v262_v12 = vpop.permute.xlu0 %261 }
  0xa1   : > { %v288_v8 = vpop.f32.mrf.mxu0 }
  0xa2   : > { %v289_v9 = vadd.f32 %v288_v8, %v257_v7 }
  0xa4   : > { %v293_v10 = vsub.f32 0.0, %v289_v9 }
  0xa6   : > { %v295_v11 = vmul.f32 1.442695, %v293_v10 }
  0xa8   : > { %500 = vpow2.f32 %v295_v11 }
  0xa9   : > { %v290_v13 = vpop.f32.mrf.mxu0 }
  0xaa   : > { %v291_v14 = vadd.f32 %v290_v13, %v262_v12 }
  0xac   : > { %v294_v15 = vsub.f32 0.0, %v291_v14 }
  0xae   : > { %v501_v16 = vpop.eup %500  ;;  %v297_v17 = vmul.f32 1.442695, %v294_v15 }
  0xaf   : > { %v299_v18 = vadd.f32 1.0, %v501_v16 }
  0xb0   : > { %502 = vpow2.f32 %v297_v17 }
  0xb1   : > { %504 = vrcp.f32 %v299_v18 }
  0xb6   : > { %v503_v19 = vpop.eup %502 }
  0xb7   : > { %v505_v20 = vpop.eup %504  ;;  %v300_v21 = vadd.f32 1.0, %v503_v19 }
  0xb8   : > { %303 = vst [vmem:[%s241_s18] sm:$0xff] %v505_v20 }
  0xb9   : > { %506 = vrcp.f32 %v300_v21 }
  0xbc   : > { %311 = sbr.rel (!%p604_p6) target bundleno = 201 (0xc9), region = 77 }
  0xbf   : > { %v507_v22 = vpop.eup %506  ;;  %v344_v23 = vld [vmem:[%s241_s18] sm:$0xff] (%p604_p6) }
  0xc0   : > { %304 = vst [vmem:[%s241_s18 + $0x8] sm:$0xff] %v507_v22 }
  0xc1   : > { %345 = vst [vmem:[%s313_s24] sm:$0xff] %v344_v23 }
  0xc7   : > { %v346_v24 = vld [vmem:[%s241_s18 + $0x8] sm:$0xff] }
  0xc8   : > { %347 = vst [vmem:[%s313_s24 + $0x18] sm:$0xff] %v346_v24 }
  0xc9 PF: > { %s13_s16 = sadd.s32 1, %s546_s16   ;;  %s655_s12 = smov %s534_s13 }
  0xca   : > { %p10_p11 = scmp.ge.s32.totalorder %s13_s16, 5   ;;  %s656_s13 = smov %s609_s22 }
  0xcb   : > { %s657_s14 = smov %s542_s15  ;;  %s658_s15 = smov %s660_s17 }
  0xcc   :  { %12 = sbr.rel (!%p10_p11) target bundleno = 3 (0x3), region = 149 }

</bundles_post_ra>
